<compile_context>
chip_gen: v6e
topology: v6e:2x2x1
jax: 0.10.0
libtpu: 0.0.40
codegen_flags: <defaults>
</compile_context>

<pallas_src>
import jax
import jax.numpy as jnp
from jax.experimental import pallas as pl
from jax.experimental.pallas import tpu as pltpu


def _round_up(a: int, b: int) -> int:
    return (a + b - 1) // b * b


def _mlp_kernel(x_ref, w1_ref, b1_ref, w2_ref, b2_ref, o_ref):
    # hidden = tanh(x @ W1 + b1): MXU matmul with f32 accumulation, bias
    # broadcast-add on the VPU (biases kept f32), tanh on the EUP.
    h = jnp.tanh(
        jnp.dot(x_ref[...], w1_ref[...], preferred_element_type=jnp.float32)
        + b1_ref[...]
    )
    # Feed the second (larger, hid x hid) matmul in the weight dtype: on the
    # bf16 path this hits the fast MXU mode on v6e/v7x; on f32 it's a no-op.
    h = h.astype(w2_ref.dtype)
    # z = hidden @ W2 + b2   (no last activation)
    o_ref[...] = (
        jnp.dot(h, w2_ref[...], preferred_element_type=jnp.float32)
        + b2_ref[...]
    ).astype(o_ref.dtype)


def _choose_tile_m(n_rows, in_p, hid_p, tile_m, align):
    """Sublane-aligned row tile that fits a sane VMEM budget and keeps >=2 grid
    steps when there is enough work (v7x has two TensorCores)."""
    tile = max(align, min(_round_up(tile_m, align), _round_up(n_rows, align)))
    # Keep the double-buffered x/out tiles within ~24 MiB of VMEM.
    while tile > align and 2 * tile * (in_p + hid_p) * 4 > (24 << 20):
        tile = max(align, _round_up(tile // 2, align))
    # Prefer at least 2 grid steps so both v7x TensorCores get work.
    if n_rows > align and _round_up(n_rows, tile) // tile < 2:
        tile = max(align, _round_up(pl.cdiv(n_rows, 2), align))
    return tile


def _pad2d(a, rows, cols):
    pr, pc = rows - a.shape[0], cols - a.shape[1]
    if pr == 0 and pc == 0:
        return a
    return jnp.pad(a, ((0, pr), (0, pc)))


def simple_quantized_encoding_forward(x, params, *, tile_m=512,
                                      compute_dtype=None, use_pallas=None):
    """Pallas forward of SimpleQuantizedEncodingModule (vq-multistage, stage 1).

    Returns (z, z_id) mirroring QuantizedTensorValue(z, z_id); z_id is None
    because quantize() is an identity at vq_stage == 1.

    compute_dtype: optional MXU operand dtype (e.g. jnp.bfloat16 on v6e/v7x);
      accumulation and biases stay f32.
    use_pallas: True/False, or None to auto-dispatch (tiny problems go to XLA).
    """
    w1, b1, w2, b2 = params
    in_dim = x.shape[-1]
    hid = w1.shape[1]
    x2d = x.reshape(-1, in_dim)
    M = x2d.shape[0]

    if use_pallas is None:
        # Below ~256 KiB of output the pallas_call fixed cost dominates; let
        # XLA fuse the two GEMMs instead.
        use_pallas = M * max(hid, 128) * 4 >= (256 << 10)
    if not use_pallas:
        z2d = jnp.tanh(x2d @ w1 + b1.reshape(1, -1)) @ w2 + b2.reshape(1, -1)
        return z2d.reshape(x.shape[:-1] + (hid,)), None

    cdtype = jnp.dtype(compute_dtype) if compute_dtype is not None else jnp.dtype(x.dtype)
    out_dtype = jnp.dtype(x.dtype)
    csize = cdtype.itemsize
    row_align = 16 if csize < 4 else 8  # bf16 packs 2 rows per sublane

    # Lane-dense padding: feature dims up to multiples of 128.
    in_p = _round_up(in_dim, 128)
    hid_p = _round_up(hid, 128)

    tile = _choose_tile_m(M, in_p, hid_p, tile_m, row_align)
    Mp = _round_up(M, tile)
    grid_m = Mp // tile

    # Zero padding is exact for matmul+tanh+matmul: padded K columns contribute
    # 0 to the dots, padded hidden columns stay tanh(0)=0 and hit zero W2 rows,
    # padded output rows/cols are sliced off below.
    xp = _pad2d(x2d, Mp, in_p).astype(cdtype)
    w1p = _pad2d(w1, in_p, hid_p).astype(cdtype)
    w2p = _pad2d(w2, hid_p, hid_p).astype(cdtype)
    b1p = _pad2d(b1.reshape(1, -1), 1, hid_p).astype(jnp.float32)
    b2p = _pad2d(b2.reshape(1, -1), 1, hid_p).astype(jnp.float32)

    # Explicit VMEM budget: double-buffered x/out tiles + (single-buffered)
    # resident weights/biases + f32 intermediate, with headroom; clamp to the
    # v7x-safe 64 MiB physical limit.
    io_bytes = 2 * tile * (in_p * csize + hid_p * out_dtype.itemsize)
    w_bytes = (in_p * hid_p + hid_p * hid_p) * csize + 2 * hid_p * 4
    scratch_bytes = tile * hid_p * 4
    vmem_limit = int(min(max(2 * (io_bytes + w_bytes + scratch_bytes), 16 << 20),
                         64 << 20))

    def _call(single_buffer_invariants):
        def const_spec(shape):
            # Grid-invariant operands: block index never changes, so a single
            # VMEM buffer is enough (halves their footprint vs. the default).
            if single_buffer_invariants:
                return pl.BlockSpec(shape, lambda i: (0, 0),
                                    pipeline_mode=pl.Buffered(buffer_count=1))
            return pl.BlockSpec(shape, lambda i: (0, 0))

        return pl.pallas_call(
            _mlp_kernel,
            out_shape=jax.ShapeDtypeStruct((Mp, hid_p), out_dtype),
            grid_spec=pltpu.PrefetchScalarGridSpec(
                num_scalar_prefetch=0,
                grid=(grid_m,),
                in_specs=[
                    pl.BlockSpec((tile, in_p), lambda i: (i, 0)),  # x row tile
                    const_spec((in_p, hid_p)),                     # W1 (full)
                    const_spec((1, hid_p)),                        # b1
                    const_spec((hid_p, hid_p)),                    # W2 (full)
                    const_spec((1, hid_p)),                        # b2
                ],
                out_specs=pl.BlockSpec((tile, hid_p), lambda i: (i, 0)),
            ),
            compiler_params=pltpu.CompilerParams(
                dimension_semantics=("parallel",),
                vmem_limit_bytes=vmem_limit,
            ),
        )(xp, w1p, b1p, w2p, b2p)

    try:
        z2d_p = _call(True)
    except Exception:
        # Older jax without BlockSpec(pipeline_mode=...)/Buffered(1): fall back
        # to default double-buffering of the (small) grid-invariant weights.
        z2d_p = _call(False)

    z2d = z2d_p[:M, :hid]
    z = z2d.reshape(x.shape[:-1] + (hid,))
    return z, None  # QuantizedTensorValue(z, z_id=None)


def init_params(key, input_dim, hidden_dim, dtype=jnp.float32):
    """Deterministic synthetic parameters (shapes match the PyTorch module).

    PyTorch Linear weight is [out, in]; we store the transposed [in, out], so
    y = x @ W + b matches torch's x @ W_torch.T + b.
    """
    k1, k2, k3, k4 = jax.random.split(key, 4)
    w1 = (jax.random.normal(k1, (input_dim, hidden_dim), dtype)
          * (1.0 / jnp.sqrt(input_dim)))
    b1 = jax.random.normal(k2, (1, hidden_dim), dtype) * 0.01
    w2 = (jax.random.normal(k3, (hidden_dim, hidden_dim), dtype)
          * (1.0 / jnp.sqrt(hidden_dim)))
    b2 = jax.random.normal(k4, (1, hidden_dim), dtype) * 0.01
    return w1, b1, w2, b2


def _reference_forward(x, params):
    w1, b1, w2, b2 = params
    in_dim = x.shape[-1]
    hid = w1.shape[1]
    z = jnp.tanh(x.reshape(-1, in_dim) @ w1 + b1) @ w2 + b2
    return z.reshape(x.shape[:-1] + (hid,))


if __name__ == "__main__":
    key = jax.random.PRNGKey(0)
    kx, kp, kx2 = jax.random.split(key, 3)

    # --- 1) module-sized toy shape (batch=2, seq=8, input=32, hidden=32) ---
    batch, seq, input_dim, hidden_dim = 2, 8, 32, 32
    x = jax.random.normal(kx, (batch, seq, input_dim), jnp.float32)
    params = init_params(kp, input_dim, hidden_dim)

    z, z_id = simple_quantized_encoding_forward(x, params, use_pallas=True)
    z = jax.block_until_ready(z)
    z_ref = _reference_forward(x, params)
    assert z.shape == (batch, seq, hidden_dim)
    assert z_id is None
    assert jnp.allclose(z, z_ref, atol=1e-5, rtol=1e-5)

    # --- 2) row count not divisible by the tile: padded-tail + tile capping ---
    x2 = jax.random.normal(kx2, (4, 200, input_dim), jnp.float32)  # 800 rows
    z2, _ = simple_quantized_encoding_forward(x2, params, tile_m=512,
                                              use_pallas=True)
    z2 = jax.block_until_ready(z2)
    assert jnp.allclose(z2, _reference_forward(x2, params), atol=1e-4, rtol=1e-4)

    # --- 3) optional bf16 MXU operand path (v6e/v7x), f32 accumulation ---
    z3, _ = simple_quantized_encoding_forward(x, params,
                                              compute_dtype=jnp.bfloat16,
                                              use_pallas=True)
    z3 = jax.block_until_ready(z3)
    assert jnp.allclose(z3, z_ref, atol=5e-2, rtol=5e-2)

    print("KERNEL_OK")
</pallas_src>

<mosaic_0001>
module attributes {stable_mosaic.version = 11 : i64} {
  func.func @_mlp_kernel(%arg0: i32, %arg1: memref<8x128xf32, #tpu.memory_space<vmem>>, %arg2: memref<128x128xf32, #tpu.memory_space<vmem>>, %arg3: memref<1x128xf32, #tpu.memory_space<vmem>>, %arg4: memref<128x128xf32, #tpu.memory_space<vmem>>, %arg5: memref<1x128xf32, #tpu.memory_space<vmem>>, %arg6: memref<8x128xf32, #tpu.memory_space<vmem>>) attributes {dimension_semantics = [#tpu.dimension_semantics<parallel>], iteration_bounds = array<i64: 2>, scalar_prefetch = 0 : i64, scratch_operands = 0 : i64, tpu.core_type = #tpu.core_type<tc>, window_params = [{transform_indices = @transform_0, window_bounds = array<i64: 8, 128>}, {pipeline_mode = #tpu.pipeline_mode<synchronous>, transform_indices = @transform_1, window_bounds = array<i64: 128, 128>}, {pipeline_mode = #tpu.pipeline_mode<synchronous>, transform_indices = @transform_2, window_bounds = array<i64: 1, 128>}, {pipeline_mode = #tpu.pipeline_mode<synchronous>, transform_indices = @transform_3, window_bounds = array<i64: 128, 128>}, {pipeline_mode = #tpu.pipeline_mode<synchronous>, transform_indices = @transform_4, window_bounds = array<i64: 1, 128>}, {transform_indices = @transform_5, window_bounds = array<i64: 8, 128>}]} {
    %c0 = arith.constant 0 : index
    %c0_0 = arith.constant 0 : index
    %0 = vector.load %arg1[%c0, %c0_0] : memref<8x128xf32, #tpu.memory_space<vmem>>, vector<8x128xf32>
    %c0_1 = arith.constant 0 : index
    %c0_2 = arith.constant 0 : index
    %1 = vector.load %arg2[%c0_1, %c0_2] : memref<128x128xf32, #tpu.memory_space<vmem>>, vector<128x128xf32>
    %cst = arith.constant dense<0.000000e+00> : vector<8x128xf32>
    %2 = tpu.matmul %0, %1, %cst {dimension_numbers = #tpu.dot_dimension_numbers<[1], [0], [0], [1], [0, 0, 1, 1], [], []>} : vector<8x128xf32>, vector<128x128xf32>, vector<8x128xf32> -> vector<8x128xf32>
    %c0_3 = arith.constant 0 : index
    %c0_4 = arith.constant 0 : index
    %3 = vector.load %arg3[%c0_3, %c0_4] : memref<1x128xf32, #tpu.memory_space<vmem>>, vector<1x128xf32>
    %4 = vector.broadcast %3 : vector<1x128xf32> to vector<8x128xf32>
    %5 = arith.addf %2, %4 : vector<8x128xf32>
    %6 = math.tanh %5 : vector<8x128xf32>
    %c0_5 = arith.constant 0 : index
    %c0_6 = arith.constant 0 : index
    %7 = vector.load %arg4[%c0_5, %c0_6] : memref<128x128xf32, #tpu.memory_space<vmem>>, vector<128x128xf32>
    %cst_7 = arith.constant dense<0.000000e+00> : vector<8x128xf32>
    %8 = tpu.matmul %6, %7, %cst_7 {dimension_numbers = #tpu.dot_dimension_numbers<[1], [0], [0], [1], [0, 0, 1, 1], [], []>} : vector<8x128xf32>, vector<128x128xf32>, vector<8x128xf32> -> vector<8x128xf32>
    %c0_8 = arith.constant 0 : index
    %c0_9 = arith.constant 0 : index
    %9 = vector.load %arg5[%c0_8, %c0_9] : memref<1x128xf32, #tpu.memory_space<vmem>>, vector<1x128xf32>
    %10 = vector.broadcast %9 : vector<1x128xf32> to vector<8x128xf32>
    %11 = arith.addf %8, %10 : vector<8x128xf32>
    %c0_10 = arith.constant 0 : index
    %c0_11 = arith.constant 0 : index
    %12 = vector.load %arg6[%c0_10, %c0_11] : memref<8x128xf32, #tpu.memory_space<vmem>>, vector<8x128xf32>
    tpu.vector_store %arg6[%c0_10, %c0_11], %11 {strides = array<i32>} : memref<8x128xf32, #tpu.memory_space<vmem>>, vector<8x128xf32>,
    return
  }
  func.func @transform_0(%arg0: i32) -> (i32, i32) {
    %c0_i32 = arith.constant 0 : i32
    %c0_i32_0 = arith.constant 0 : i32
    return %arg0, %c0_i32 : i32, i32
  }
  func.func @transform_1(%arg0: i32) -> (i32, i32) {
    %c0_i32 = arith.constant 0 : i32
    %c0_i32_0 = arith.constant 0 : i32
    %c0_i32_1 = arith.constant 0 : i32
    return %c0_i32, %c0_i32_0 : i32, i32
  }
  func.func @transform_2(%arg0: i32) -> (i32, i32) {
    %c0_i32 = arith.constant 0 : i32
    %c0_i32_0 = arith.constant 0 : i32
    %c0_i32_1 = arith.constant 0 : i32
    return %c0_i32, %c0_i32_0 : i32, i32
  }
  func.func @transform_3(%arg0: i32) -> (i32, i32) {
    %c0_i32 = arith.constant 0 : i32
    %c0_i32_0 = arith.constant 0 : i32
    %c0_i32_1 = arith.constant 0 : i32
    return %c0_i32, %c0_i32_0 : i32, i32
  }
  func.func @transform_4(%arg0: i32) -> (i32, i32) {
    %c0_i32 = arith.constant 0 : i32
    %c0_i32_0 = arith.constant 0 : i32
    %c0_i32_1 = arith.constant 0 : i32
    return %c0_i32, %c0_i32_0 : i32, i32
  }
  func.func @transform_5(%arg0: i32) -> (i32, i32) {
    %c0_i32 = arith.constant 0 : i32
    %c0_i32_0 = arith.constant 0 : i32
    return %arg0, %c0_i32 : i32, i32
  }
}

module attributes {stable_mosaic.version = 11 : i64} {
  func.func @_mlp_kernel(%arg0: i32, %arg1: memref<8x128xf32, #tpu.memory_space<vmem>>, %arg2: memref<128x128xf32, #tpu.memory_space<vmem>>, %arg3: memref<1x128xf32, #tpu.memory_space<vmem>>, %arg4: memref<128x128xf32, #tpu.memory_space<vmem>>, %arg5: memref<1x128xf32, #tpu.memory_space<vmem>>, %arg6: memref<8x128xf32, #tpu.memory_space<vmem>>) attributes {dimension_semantics = [#tpu.dimension_semantics<parallel>], iteration_bounds = array<i64: 2>, scalar_prefetch = 0 : i64, scratch_operands = 0 : i64, tpu.core_type = #tpu.core_type<tc>, window_params = [{transform_indices = @transform_0, window_bounds = array<i64: 8, 128>}, {pipeline_mode = #tpu.pipeline_mode<synchronous>, transform_indices = @transform_1, window_bounds = array<i64: 128, 128>}, {pipeline_mode = #tpu.pipeline_mode<synchronous>, transform_indices = @transform_2, window_bounds = array<i64: 1, 128>}, {pipeline_mode = #tpu.pipeline_mode<synchronous>, transform_indices = @transform_3, window_bounds = array<i64: 128, 128>}, {pipeline_mode = #tpu.pipeline_mode<synchronous>, transform_indices = @transform_4, window_bounds = array<i64: 1, 128>}, {transform_indices = @transform_5, window_bounds = array<i64: 8, 128>}]} {
    %c0 = arith.constant 0 : index
    %c0_0 = arith.constant 0 : index
    %0 = vector.load %arg1[%c0, %c0_0] : memref<8x128xf32, #tpu.memory_space<vmem>>, vector<8x128xf32>
    %c0_1 = arith.constant 0 : index
    %c0_2 = arith.constant 0 : index
    %1 = vector.load %arg2[%c0_1, %c0_2] : memref<128x128xf32, #tpu.memory_space<vmem>>, vector<128x128xf32>
    %cst = arith.constant dense<0.000000e+00> : vector<8x128xf32>
    %2 = tpu.matmul %0, %1, %cst {dimension_numbers = #tpu.dot_dimension_numbers<[1], [0], [0], [1], [0, 0, 1, 1], [], []>} : vector<8x128xf32>, vector<128x128xf32>, vector<8x128xf32> -> vector<8x128xf32>
    %c0_3 = arith.constant 0 : index
    %c0_4 = arith.constant 0 : index
    %3 = vector.load %arg3[%c0_3, %c0_4] : memref<1x128xf32, #tpu.memory_space<vmem>>, vector<1x128xf32>
    %4 = vector.broadcast %3 : vector<1x128xf32> to vector<8x128xf32>
    %5 = arith.addf %2, %4 : vector<8x128xf32>
    %6 = math.tanh %5 : vector<8x128xf32>
    %c0_5 = arith.constant 0 : index
    %c0_6 = arith.constant 0 : index
    %7 = vector.load %arg4[%c0_5, %c0_6] : memref<128x128xf32, #tpu.memory_space<vmem>>, vector<128x128xf32>
    %cst_7 = arith.constant dense<0.000000e+00> : vector<8x128xf32>
    %8 = tpu.matmul %6, %7, %cst_7 {dimension_numbers = #tpu.dot_dimension_numbers<[1], [0], [0], [1], [0, 0, 1, 1], [], []>} : vector<8x128xf32>, vector<128x128xf32>, vector<8x128xf32> -> vector<8x128xf32>
    %c0_8 = arith.constant 0 : index
    %c0_9 = arith.constant 0 : index
    %9 = vector.load %arg5[%c0_8, %c0_9] : memref<1x128xf32, #tpu.memory_space<vmem>>, vector<1x128xf32>
    %10 = vector.broadcast %9 : vector<1x128xf32> to vector<8x128xf32>
    %11 = arith.addf %8, %10 : vector<8x128xf32>
    %c0_10 = arith.constant 0 : index
    %c0_11 = arith.constant 0 : index
    %12 = vector.load %arg6[%c0_10, %c0_11] : memref<8x128xf32, #tpu.memory_space<vmem>>, vector<8x128xf32>
    tpu.vector_store %arg6[%c0_10, %c0_11], %11 {strides = array<i32>} : memref<8x128xf32, #tpu.memory_space<vmem>>, vector<8x128xf32>,
    return
  }
  func.func @transform_0(%arg0: i32) -> (i32, i32) {
    %c0_i32 = arith.constant 0 : i32
    %c0_i32_0 = arith.constant 0 : i32
    return %arg0, %c0_i32 : i32, i32
  }
  func.func @transform_1(%arg0: i32) -> (i32, i32) {
    %c0_i32 = arith.constant 0 : i32
    %c0_i32_0 = arith.constant 0 : i32
    %c0_i32_1 = arith.constant 0 : i32
    return %c0_i32, %c0_i32_0 : i32, i32
  }
  func.func @transform_2(%arg0: i32) -> (i32, i32) {
    %c0_i32 = arith.constant 0 : i32
    %c0_i32_0 = arith.constant 0 : i32
    %c0_i32_1 = arith.constant 0 : i32
    return %c0_i32, %c0_i32_0 : i32, i32
  }
  func.func @transform_3(%arg0: i32) -> (i32, i32) {
    %c0_i32 = arith.constant 0 : i32
    %c0_i32_0 = arith.constant 0 : i32
    %c0_i32_1 = arith.constant 0 : i32
    return %c0_i32, %c0_i32_0 : i32, i32
  }
  func.func @transform_4(%arg0: i32) -> (i32, i32) {
    %c0_i32 = arith.constant 0 : i32
    %c0_i32_0 = arith.constant 0 : i32
    %c0_i32_1 = arith.constant 0 : i32
    return %c0_i32, %c0_i32_0 : i32, i32
  }
  func.func @transform_5(%arg0: i32) -> (i32, i32) {
    %c0_i32 = arith.constant 0 : i32
    %c0_i32_0 = arith.constant 0 : i32
    return %arg0, %c0_i32 : i32, i32
  }
}

</mosaic_0001>

<bundles_post_ra>
// kernel: tpu_custom_call.1
= control target key start
LH: loop header
LB: loop body
LE: loop exit
PB: predicated region body
PF: predicated region fallthrough
CT: control target
= control target key end

     0   :  { %10 = vsyncpa [#allocation3], 0  ;;  %s1162_s0 = inlined_call_operand.hbm [shape: f32[16,128], index: 0, kind: input, shape index: {}]   ;;  %s1163_s1 = inlined_call_operand.hbm [shape: f32[128,128], index: 1, kind: input, shape index: {}]   ;;  %s1164_s2 = inlined_call_operand.vmem [shape: f32[1,128], index: 2, kind: input, shape index: {}]   ;;  %s1165_s3 = inlined_call_operand.hbm [shape: f32[128,128], index: 3, kind: input, shape index: {}]   ;;  %s1166_s4 = inlined_call_operand.vmem [shape: f32[1,128], index: 4, kind: input, shape index: {}]   ;;  %s1167_s5 = inlined_call_operand.hbm [shape: f32[16,128], index: 5, kind: output, shape index: {}]  }
   0x1   :  { %12 = vsyncpa [#allocation3 + $0x1], 0 }
   0x2   :  { %13 = vsyncpa [#allocation6], 0 }
   0x3   :  { %14 = vsyncpa [#allocation4], 0 }
   0x4   :  { %16 = vsyncpa [#allocation4 + $0x1], 0  ;;  %s944_s18 = smov 0   ;;  %s946_s19 = smov 0  }
   0x5   :  { %s948_s20 = smov 0   ;;  %s950_s21 = smov 0  }
   0x6 LB: > { %s965_s22 = sadd.s32 4294967295, %s904_s21   ;;  %s561_s23 = sadd.s32 4294967294, %s904_s21   ;;  %s904_s21 = sphi %s950_s21, %s1189_s21   ;;  %s900_s20 = sphi %s948_s20, %s1188_s20   ;;  %s896_s19 = sphi %s946_s19, %s1187_s19   ;;  %s892_s18 = sphi %s944_s18, %s1186_s18  }
   0x7   : > { %p42_p0 = scmp.ne.s32.totalorder %s896_s19, %s892_s18  ;;  %p1168_p1 = scmp.eq.s32.totalorder %s965_s22, 0 }
   0x8   : > { %p156_p3 = scmp.eq.s32.totalorder %s561_s23, 1  ;;  %p562_p5 = scmp.ge.s32.totalorder %s904_s21, 1 }
   0x9   : > { %p974_p4 = por %p1168_p1, %p42_p0  ;;  %p163_p7 = scmp.lt.s32.totalorder %s904_s21, 3 }
   0xa   : > { %p979_p6 = por %p156_p3, %p42_p0  ;;  %s906_s27 = smov [#allocation5]  }
   0xb   : > { %s1172_s24 = scalar_select %p974_p4, 1, 0 }
   0xc   : > { %s1173_s25 = scalar_select %p979_p6, 1, 0 }
   0xd   : > { %p984_p8 = pnand %p562_p5, %p163_p7  ;;  %s175_s28 = sshll.u32 %s906_s27, 4  ;;  %s176_s28 = int_to_ptr.vmem [resolvable:$true] %s175_s28 }
   0xe   : > { %s907_s30 = smov [#allocation7]   ;;  %s767_s7 = scalar_lea.vmem %s176_s28, 2048 }
   0xf   : > { %s1174_s26 = scalar_select %p984_p8, 1, 0 }
  0x10   : > { %p695_p9 = pneg %p984_p8  ;;  %s191_s6 = sshll.u32 %s907_s30, 4  ;;  %s192_s6 = int_to_ptr.vmem [resolvable:$true] %s191_s6 }
  0x11   : > { %p768_p13 = scmp.ne.s32.totalorder %s176_s28, %s767_s7  ;;  %p775_p5 = scmp.lt.s32.totalorder %s176_s28, %s176_s28 }
  0x12   : > { %p993_p11 = pnand %p695_p9, %p1168_p1  ;;  %p776_p7 = scmp.lt.s32.totalorder %s767_s7, %s767_s7 }
  0x14   : > { %p758_p12 = pneg %p993_p11  ;;  %p777_p10 = por %p776_p7, %p775_p5 }
  0x16   : > { %p770_p0 = pnand %p768_p13, %p758_p12 }
  0x18   : > { %p771_p3 = pneg %p770_p0 }
  0x1a   : > { %p778_p9 = pnand %p777_p10, %p771_p3 }
  0x1c   : > { %781 = shalt.err (!%p778_p9)
}
  0x1d   : > { %s908_s8 = smov 128   ;;  %s909_s9 = smov 8  }
  0x1e   : > { %698 = dma.hbm_to_vmem [thread:$0]  (!%p993_p11), %s1163_s1, 2048, %s176_s28, [#allocation6], %s908_s8, %s908_s8, %s909_s9  }
  0x1f   : > { %s793_s12 = scalar_lea.vmem %s192_s6, 2048  ;;  %p801_p2 = scmp.lt.s32.totalorder %s192_s6, %s192_s6 }
  0x20   : > { %p794_p1 = scmp.ne.s32.totalorder %s192_s6, %s793_s12  ;;  %p802_p6 = scmp.lt.s32.totalorder %s793_s12, %s793_s12 }
  0x22   : > { %p796_p13 = pnand %p794_p1, %p758_p12  ;;  %p803_p5 = por %p802_p6, %p801_p2 }
  0x24   : > { %p797_p0 = pneg %p796_p13 }
  0x26   : > { %p804_p10 = pnand %p803_p5, %p797_p0 }
  0x28   : > { %807 = shalt.err (!%p804_p10)
}
  0x29   : > { %701 = dma.hbm_to_vmem [thread:$0]  (!%p993_p11), %s1165_s3, 2048, %s192_s6, [#allocation6], %s908_s8, %s908_s8, %s909_s9  }
  0x2a   : > { %s1016_s15 = sadd.s32 1, %s904_s21   ;;  %s29_s16 = sadd.s32 1, %s900_s20 }
  0x2b   : > { %s26_s17 = ssub.s32 %s904_s21, %s1016_s15  ;;  %p36_p1 = scmp.ne.s32.totalorder %s900_s20, %s896_s19 }
  0x2c   : > { %p27_p2 = scmp.eq.s32.totalorder %s26_s17, 0  ;;  %p37_p6 = scmp.eq.s32.totalorder %s904_s21, 0 }
  0x2d   : > { %p1176_p12 = scmp.eq.s32.totalorder %s965_s22, 1  ;;  %p712_p7 = scmp.lt.s32.totalorder %s904_s21, 2 }
  0x2e   : > { %s1032_s27 = scalar_select %p27_p2, %s900_s20, %s29_s16  }
  0x2f   : > { %p1026_p3 = por %p1176_p12, %p36_p1  ;;  %p38_p9 = por %p37_p6, %p36_p1 }
  0x30   : > { %s208_s28 = sand.u32 1, %s900_s20   ;;  %s567_s30 = sshll.u32 %s904_s21, 7 }
  0x31   : > { %s1177_s23 = scalar_select %p1026_p3, 1, 0 }
  0x32   : > { %s566_s29 = sshll.u32 %s208_s28, 3  ;;  %s1039_s8 = scalar_lea.hbm %s1162_s0, %s567_s30 }
  0x33   : > { %s212_s9 = scalar_lea.vmem [#allocation2], %s566_s29  ;;  %p1041_p11 = pnand %p712_p7, %p38_p9 }
  0x34   : > { %s219_s10 = sshll.u32 %s212_s9, 4  ;;  %s209_s12 = scalar_lea.sflag [#allocation3], %s208_s28  ;;  %s220_s10 = int_to_ptr.vmem [resolvable:$true] %s219_s10 }
  0x35   : > { %s808_s13 = scalar_lea.hbm %s1039_s8, 128  ;;  %p810_p0 = pneg %p1041_p11 }
  0x36   : > { %p809_p13 = scmp.ne.s32.totalorder %s1039_s8, %s808_s13  ;;  %s813_s17 = scalar_lea.hbm %s1162_s0, 256 }
  0x37   : > { %p814_p1 = scmp.lt.s32.totalorder %s1039_s8, %s1162_s0  ;;  %p815_p2 = scmp.lt.s32.totalorder %s813_s17, %s808_s13 }
  0x38   : > { %p811_p5 = pnand %p810_p0, %p809_p13 }
  0x39   : > { %p816_p6 = por %p815_p2, %p814_p1 }
  0x3a   : > { %p812_p10 = pneg %p811_p5 }
  0x3c   : > { %p817_p12 = pnand %p816_p6, %p812_p10 }
  0x3e   : > { %820 = shalt.err (!%p817_p12)
}
  0x3f   : > { %s821_s6 = scalar_lea.vmem %s220_s10, 128  ;;  %s910_s28 = smov [#allocation2]  }
  0x40   : > { %p822_p7 = scmp.ne.s32.totalorder %s220_s10, %s821_s6  ;;  %s826_s7 = sshll.u32 %s910_s28, 4  ;;  %s827_s7 = int_to_ptr.vmem [resolvable:$false] %s826_s7 }
  0x41   : > { %s828_s9 = scalar_lea.vmem %s827_s7, 256  ;;  %p829_p13 = scmp.lt.s32.totalorder %s220_s10, %s827_s7 }
  0x42   : > { %p824_p9 = pnand %p822_p7, %p810_p0  ;;  %p830_p5 = scmp.lt.s32.totalorder %s828_s9, %s821_s6 }
  0x44   : > { %p825_p3 = pneg %p824_p9  ;;  %p831_p4 = por %p830_p5, %p829_p13 }
  0x46   : > { %p832_p8 = pnand %p831_p4, %p825_p3 }
  0x48   : > { %835 = shalt.err (!%p832_p8)
}
  0x49   : > { %705 = dma.hbm_to_vmem [thread:$0]  (!%p1041_p11), %s1039_s8, 128, %s220_s10, %s209_s12  }
  0x4a   : > { %p1179_p10 = scmp.ne.s32.totalorder %s1174_s26, 0 }
  0x4b   : > { %s1062_s13 = sand.u32 (!%p1179_p10), 1, %s896_s19   ;;  %p1180_p4 = scmp.ne.s32.totalorder (!%p1179_p10), %s1172_s24, 0 }
  0x4c   : > { %228 = sbr.rel (%p1179_p10) target bundleno = 536 (0x218), region = 40  ;;  %s569_s14 = sshll.u32 (!%p1179_p10), %s1062_s13, 3 }
  0x4d   : > { %s231_s16 = scalar_lea.sflag (!%p1179_p10), [#allocation3], %s1062_s13  ;;  %s1068_s17 = scalar_lea.vmem (!%p1179_p10), [#allocation2], %s569_s14 }
  0x51   : > { %879 = dma.done.wait (%p1180_p4), %s231_s16, 128  }
  0x52   : > { %881 = vsyncadd (%p1180_p4), %s231_s16, 4294967168  ;;  %p1181_p8 = scmp.eq.s32.totalorder %s965_s22, 0 }
  0x54   : > { %883 = dma.done.wait (%p1181_p8), [#allocation6], 4096   ;;  %p1182_p3 = pmov %p1181_p8 }
  0x55   : > { %v911_v0 = vmov 0.0   ;;  %vm912_vm0 = vmmov 0   ;;  %v285_v1 = vld [vmem:[#allocation5 + $0x78] sm:$0xff]  ;;  %v284_v2 = vld [vmem:[#allocation5 + $0x70] sm:$0xff]  ;;  %v283_v3 = vld [vmem:[#allocation5 + $0x68] sm:$0xff]  ;;  %s576_s11 = sshll.u32 %s965_s22, 7 }
  0x56   : > { %885 = vsyncadd (%p1182_p3), [#allocation6], 4294963200  ;;  %613 = vmatprep.subr.mxu0 %v911_v0  ;;  %645 = vmatprep.mubr.msk.f32.mxu0 %vm912_vm0, %v911_v0  ;;  %v282_v4 = vld [vmem:[#allocation5 + $0x60] sm:$0xff]  ;;  %v379_v5 = vld [vmem:[#allocation7 + $0x78] sm:$0xff]  ;;  %s268_s12 = scalar_lea.vmem [#allocation8], %s569_s14  ;;  %s1125_s28 = scalar_lea.hbm %s1167_s5, %s576_s11 }
  0x57   : > { %648 = vmatprep.subr.mxu1 %v911_v0  ;;  %680 = vmatprep.mubr.msk.f32.mxu1 %vm912_vm0, %v911_v0  ;;  %v281_v6 = vld [vmem:[#allocation5 + $0x58] sm:$0xff]  ;;  %v378_v7 = vld [vmem:[#allocation7 + $0x70] sm:$0xff]  ;;  %v377_v8 = vld [vmem:[#allocation7 + $0x68] sm:$0xff]  ;;  %s472_s30 = sshll.u32 %s268_s12, 4  ;;  %s459_s7 = scalar_lea.sflag [#allocation4], %s1062_s13  ;;  %s473_s30 = int_to_ptr.vmem [resolvable:$true] %s472_s30 }
  0x58   : > { %614 = vmatpush3.msra.mxu0 %v285_v1  ;;  %649 = vmatpush3.msra.mxu1 %v379_v5  ;;  %v280_v9 = vld [vmem:[#allocation5 + $0x50] sm:$0xff]  ;;  %v376_v10 = vld [vmem:[#allocation7 + $0x60] sm:$0xff]  ;;  %v279_v11 = vld [vmem:[#allocation5 + $0x48] sm:$0xff]  ;;  %s836_s9 = scalar_lea.vmem %s473_s30, 128  ;;  %p1183_p0 = scmp.ne.s32.totalorder %s1177_s23, 0 }
  0x59   : > { %615 = vmatprep.subr.mxu0 %v911_v0  ;;  %650 = vmatprep.subr.mxu1 %v911_v0  ;;  %v375_v12 = vld [vmem:[#allocation7 + $0x58] sm:$0xff]  ;;  %v278_v13 = vld [vmem:[#allocation5 + $0x40] sm:$0xff]  ;;  %v374_v14 = vld [vmem:[#allocation7 + $0x50] sm:$0xff]  ;;  %p837_p11 = scmp.ne.s32.totalorder %s473_s30, %s836_s9  ;;  %s913_s22 = smov [#allocation8]  }
  0x5a   : > { %616 = vmatpush3.msra.mxu0 %v284_v2  ;;  %651 = vmatpush3.msra.mxu1 %v378_v7  ;;  %v277_v15 = vld [vmem:[#allocation5 + $0x38] sm:$0xff]  ;;  %v373_v16 = vld [vmem:[#allocation7 + $0x48] sm:$0xff]  ;;  %v276_v17 = vld [vmem:[#allocation5 + $0x30] sm:$0xff]  ;;  %s840_s16 = sshll.u32 %s913_s22, 4  ;;  %s841_s16 = int_to_ptr.vmem [resolvable:$false] %s840_s16 }
  0x5b   : > { %617 = vmatprep.subr.mxu0 %v911_v0  ;;  %652 = vmatprep.subr.mxu1 %v911_v0  ;;  %v275_v18 = vld [vmem:[#allocation5 + $0x28] sm:$0xff]  ;;  %v274_v19 = vld [vmem:[#allocation5 + $0x20] sm:$0xff]  ;;  %v273_v20 = vld [vmem:[#allocation5 + $0x18] sm:$0xff]  ;;  %p838_p1 = pnand %p837_p11, %p1183_p0  ;;  %s842_s14 = scalar_lea.vmem %s841_s16, 256 }
  0x5c   : > { %618 = vmatpush3.msra.mxu0 %v283_v3  ;;  %653 = vmatpush3.msra.mxu1 %v377_v8  ;;  %v272_v21 = vld [vmem:[#allocation5 + $0x10] sm:$0xff]  ;;  %v271_v22 = vld [vmem:[#allocation5 + $0x8] sm:$0xff]  ;;  %v270_v23 = vld [vmem:[#allocation5] sm:$0xff]  ;;  %p843_p6 = scmp.lt.s32.totalorder %s473_s30, %s841_s16  ;;  %p844_p12 = scmp.lt.s32.totalorder %s842_s14, %s836_s9 }
  0x5d   : > { %619 = vmatprep.subr.mxu0 %v911_v0  ;;  %654 = vmatprep.subr.mxu1 %v911_v0  ;;  %v269_v24 = vld [vmem:[%s1068_s17] sm:$0xff]  ;;  %v372_v25 = vld [vmem:[#allocation7 + $0x40] sm:$0xff]  ;;  %v369_v28 = vld [vmem:[#allocation7 + $0x28] sm:$0xff]  ;;  %p839_p2 = pneg %p838_p1 }
  0x5e   : > { %620 = vmatpush3.msra.mxu0 %v282_v4  ;;  %655 = vmatpush3.msra.mxu1 %v376_v10  ;;  %v371_v26 = vld [vmem:[#allocation7 + $0x38] sm:$0xff]  ;;  %v370_v27 = vld [vmem:[#allocation7 + $0x30] sm:$0xff]  ;;  %v368_v29 = vld [vmem:[#allocation7 + $0x20] sm:$0xff]  ;;  %p845_p7 = por %p844_p12, %p843_p6 }
  0x5f   : > { %621 = vmatprep.subr.mxu0 %v911_v0  ;;  %656 = vmatprep.subr.mxu1 %v911_v0  ;;  %v367_v30 = vld [vmem:[#allocation7 + $0x18] sm:$0xff]  ;;  %v366_v31 = vld [vmem:[#allocation7 + $0x10] sm:$0xff]  ;;  %v365_v32 = vld [vmem:[#allocation7 + $0x8] sm:$0xff] }
  0x60   : > { %622 = vmatpush3.msra.mxu0 %v281_v6  ;;  %657 = vmatpush3.msra.mxu1 %v375_v12  ;;  %v364_v33 = vld [vmem:[#allocation7] sm:$0xff]  ;;  %v573_v34 = vld [vmem:[%s1164_s2] ss:$0 sm:$0xff]  ;;  %p846_p9 = pnand %p845_p7, %p839_p2 }
  0x61   : > { %623 = vmatprep.subr.mxu0 %v911_v0  ;;  %658 = vmatprep.subr.mxu1 %v911_v0  ;;  %v574_v39 = vld [vmem:[%s1166_s4] ss:$0 sm:$0xff] }
  0x62   : > { %624 = vmatpush3.msra.mxu0 %v280_v9  ;;  %659 = vmatpush3.msra.mxu1 %v374_v14 }
  0x63   : > { %625 = vmatprep.subr.mxu0 %v911_v0  ;;  %660 = vmatprep.subr.mxu1 %v911_v0 }
  0x64   : > { %626 = vmatpush3.msra.mxu0 %v279_v11  ;;  %661 = vmatpush3.msra.mxu1 %v373_v16 }
  0x65   : > { %627 = vmatprep.subr.mxu0 %v911_v0  ;;  %662 = vmatprep.subr.mxu1 %v911_v0 }
  0x66   : > { %628 = vmatpush3.msra.mxu0 %v278_v13  ;;  %663 = vmatpush3.msra.mxu1 %v372_v25 }
  0x67   : > { %629 = vmatprep.subr.mxu0 %v911_v0  ;;  %664 = vmatprep.subr.mxu1 %v911_v0 }
  0x68   : > { %630 = vmatpush3.msra.mxu0 %v277_v15  ;;  %665 = vmatpush3.msra.mxu1 %v371_v26 }
  0x69   : > { %631 = vmatprep.subr.mxu0 %v911_v0  ;;  %666 = vmatprep.subr.mxu1 %v911_v0 }
  0x6a   : > { %632 = vmatpush3.msra.mxu0 %v276_v17  ;;  %667 = vmatpush3.msra.mxu1 %v370_v27 }
  0x6b   : > { %633 = vmatprep.subr.mxu0 %v911_v0  ;;  %668 = vmatprep.subr.mxu1 %v911_v0 }
  0x6c   : > { %634 = vmatpush3.msra.mxu0 %v275_v18  ;;  %669 = vmatpush3.msra.mxu1 %v369_v28 }
  0x6d   : > { %635 = vmatprep.subr.mxu0 %v911_v0  ;;  %670 = vmatprep.subr.mxu1 %v911_v0 }
  0x6e   : > { %636 = vmatpush3.msra.mxu0 %v274_v19  ;;  %671 = vmatpush3.msra.mxu1 %v368_v29 }
  0x6f   : > { %637 = vmatprep.subr.mxu0 %v911_v0  ;;  %672 = vmatprep.subr.mxu1 %v911_v0 }
  0x70   : > { %638 = vmatpush3.msra.mxu0 %v273_v20  ;;  %673 = vmatpush3.msra.mxu1 %v367_v30 }
  0x71   : > { %639 = vmatprep.subr.mxu0 %v911_v0  ;;  %674 = vmatprep.subr.mxu1 %v911_v0 }
  0x72   : > { %640 = vmatpush3.msra.mxu0 %v272_v21  ;;  %675 = vmatpush3.msra.mxu1 %v366_v31 }
  0x73   : > { %641 = vmatprep.subr.mxu0 %v911_v0  ;;  %676 = vmatprep.subr.mxu1 %v911_v0 }
  0x74   : > { %642 = vmatpush3.msra.mxu0 %v271_v22  ;;  %677 = vmatpush3.msra.mxu1 %v365_v32 }
  0x75   : > { %643 = vmatprep.subr.mxu0 %v911_v0  ;;  %678 = vmatprep.subr.mxu1 %v911_v0 }
  0x76   : > { %644 = vmatpush3.msra.mxu0 %v270_v23  ;;  %679 = vmatpush3.msra.mxu1 %v364_v33 }
  0x77   : > { %646 = vmatmul.mubr.f32.vlgmr.msra.gmra.mxu0 %v269_v24 }
 0x137   : > { %v359_v35 = vpop.f32.mrf.mxu0 }
 0x138   : > { %v360_v36 = vadd.f32 %v573_v34, %v359_v35 }
 0x139   : > { %v647_v37 = vpop.f32.mrf.mxu0 }
 0x13a   : > { %754 = vtanh.f32 %v360_v36 }
 0x147   : > { %v755_v38 = vpop.eup %754 }
 0x148   : > { %681 = vmatmul.mubr.f32.vlgmr.msra.gmra.mxu1 %v755_v38 }
 0x208   : > { %v453_v40 = vpop.f32.mrf.mxu1 }
 0x209   : > { %v454_v41 = vadd.f32 %v574_v39, %v453_v40 }
 0x20a   : > { %v682_v42 = vpop.f32.mrf.mxu1 }
 0x20b   : > { %457 = vst [vmem:[%s268_s12] sm:$0xff] %v454_v41 }
 0x20c   : > { %849 = shalt.err (!%p846_p9)
}
 0x20d   : > { %s850_s17 = scalar_lea.hbm %s1125_s28, 128  ;;  %s854_s26 = scalar_lea.hbm %s1167_s5, 256 }
 0x20e   : > { %p851_p13 = scmp.ne.s32.totalorder %s1125_s28, %s850_s17  ;;  %p855_p4 = scmp.lt.s32.totalorder %s1125_s28, %s1167_s5 }
 0x20f   : > { %p856_p8 = scmp.lt.s32.totalorder %s854_s26, %s850_s17 }
 0x210   : > { %p852_p5 = pnand %p851_p13, %p1183_p0 }
 0x211   : > { %p857_p3 = por %p856_p8, %p855_p4 }
 0x212   : > { %p853_p10 = pneg %p852_p5 }
 0x214   : > { %p858_p11 = pnand %p857_p3, %p853_p10 }
 0x216   : > { %861 = shalt.err (!%p858_p11)
}
 0x217   : > { %693 = dma.vmem_to_hbm [thread:$0]  (%p1183_p0), %s473_s30, 128, %s1125_s28, %s459_s7  }
 0x218 PF: > { %s484_s11 = sand.u32 1, %s892_s18   ;;  %p1184_p1 = scmp.ne.s32.totalorder %s1173_s25, 0 }
 0x219   : > { %p1185_p2 = scmp.ge.s32.totalorder %s904_s21, 2  ;;  %s485_s12 = scalar_lea.sflag [#allocation4], %s484_s11 }
 0x21b   : > { %p707_p6 = pnand %p1185_p2, %p1184_p1 }
 0x21d   : > { %p708_p12 = pneg %p707_p6 }
 0x21f   : > { %887 = dma.done.wait (%p708_p12), %s485_s12, 128  }
 0x220   : > { %889 = vsyncadd (%p708_p12), %s485_s12, 4294967168  ;;  %p19_p7 = scmp.ge.s32.totalorder %s1016_s15, 4   ;;  %s1186_s18 = smov %s896_s19 }
 0x221   : > { %s1187_s19 = smov %s900_s20  ;;  %s1188_s20 = smov %s1032_s27 }
 0x222   : > { %s1189_s21 = smov %s1016_s15  ;;  %21 = sbr.rel (!%p19_p7) target bundleno = 6 (0x6), region = 93 }
 0x227   :  { %490 = vsyncpa [#allocation3], 1 }
 0x228   :  { %492 = vsyncpa [#allocation3 + $0x1], 1 }
 0x229   :  { %493 = vsyncpa [#allocation6], 1 }
 0x22a   :  { %494 = vsyncpa [#allocation4], 1 }
 0x22b   :  { %496 = vsyncpa [#allocation4 + $0x1], 1 }

// kernel: tpu_custom_call.1
= control target key start
LH: loop header
LB: loop body
LE: loop exit
PB: predicated region body
PF: predicated region fallthrough
CT: control target
= control target key end

     0   :  { %10 = vsyncpa [#allocation3], 0  ;;  %s1162_s0 = inlined_call_operand.hbm [shape: f32[16,128], index: 0, kind: input, shape index: {}]   ;;  %s1163_s1 = inlined_call_operand.hbm [shape: f32[128,128], index: 1, kind: input, shape index: {}]   ;;  %s1164_s2 = inlined_call_operand.vmem [shape: f32[1,128], index: 2, kind: input, shape index: {}]   ;;  %s1165_s3 = inlined_call_operand.hbm [shape: f32[128,128], index: 3, kind: input, shape index: {}]   ;;  %s1166_s4 = inlined_call_operand.vmem [shape: f32[1,128], index: 4, kind: input, shape index: {}]   ;;  %s1167_s5 = inlined_call_operand.hbm [shape: f32[16,128], index: 5, kind: output, shape index: {}]  }
   0x1   :  { %12 = vsyncpa [#allocation3 + $0x1], 0 }
   0x2   :  { %13 = vsyncpa [#allocation6], 0 }
   0x3   :  { %14 = vsyncpa [#allocation4], 0 }
   0x4   :  { %16 = vsyncpa [#allocation4 + $0x1], 0  ;;  %s944_s18 = smov 0   ;;  %s946_s19 = smov 0  }
   0x5   :  { %s948_s20 = smov 0   ;;  %s950_s21 = smov 0  }
   0x6 LB: > { %s965_s22 = sadd.s32 4294967295, %s904_s21   ;;  %s561_s23 = sadd.s32 4294967294, %s904_s21   ;;  %s904_s21 = sphi %s950_s21, %s1189_s21   ;;  %s900_s20 = sphi %s948_s20, %s1188_s20   ;;  %s896_s19 = sphi %s946_s19, %s1187_s19   ;;  %s892_s18 = sphi %s944_s18, %s1186_s18  }
   0x7   : > { %p42_p0 = scmp.ne.s32.totalorder %s896_s19, %s892_s18  ;;  %p1168_p1 = scmp.eq.s32.totalorder %s965_s22, 0 }
   0x8   : > { %p156_p3 = scmp.eq.s32.totalorder %s561_s23, 1  ;;  %p562_p5 = scmp.ge.s32.totalorder %s904_s21, 1 }
   0x9   : > { %p974_p4 = por %p1168_p1, %p42_p0  ;;  %p163_p7 = scmp.lt.s32.totalorder %s904_s21, 3 }
   0xa   : > { %p979_p6 = por %p156_p3, %p42_p0  ;;  %s906_s27 = smov [#allocation5]  }
   0xb   : > { %s1172_s24 = scalar_select %p974_p4, 1, 0 }
   0xc   : > { %s1173_s25 = scalar_select %p979_p6, 1, 0 }
   0xd   : > { %p984_p8 = pnand %p562_p5, %p163_p7  ;;  %s175_s28 = sshll.u32 %s906_s27, 4  ;;  %s176_s28 = int_to_ptr.vmem [resolvable:$true] %s175_s28 }
   0xe   : > { %s907_s30 = smov [#allocation7]   ;;  %s767_s7 = scalar_lea.vmem %s176_s28, 2048 }
   0xf   : > { %s1174_s26 = scalar_select %p984_p8, 1, 0 }
  0x10   : > { %p695_p9 = pneg %p984_p8  ;;  %s191_s6 = sshll.u32 %s907_s30, 4  ;;  %s192_s6 = int_to_ptr.vmem [resolvable:$true] %s191_s6 }
  0x11   : > { %p768_p13 = scmp.ne.s32.totalorder %s176_s28, %s767_s7  ;;  %p775_p5 = scmp.lt.s32.totalorder %s176_s28, %s176_s28 }
  0x12   : > { %p993_p11 = pnand %p695_p9, %p1168_p1  ;;  %p776_p7 = scmp.lt.s32.totalorder %s767_s7, %s767_s7 }
  0x14   : > { %p758_p12 = pneg %p993_p11  ;;  %p777_p10 = por %p776_p7, %p775_p5 }
  0x16   : > { %p770_p0 = pnand %p768_p13, %p758_p12 }
  0x18   : > { %p771_p3 = pneg %p770_p0 }
  0x1a   : > { %p778_p9 = pnand %p777_p10, %p771_p3 }
  0x1c   : > { %781 = shalt.err (!%p778_p9)
}
  0x1d   : > { %s908_s8 = smov 128   ;;  %s909_s9 = smov 8  }
  0x1e   : > { %698 = dma.hbm_to_vmem [thread:$0]  (!%p993_p11), %s1163_s1, 2048, %s176_s28, [#allocation6], %s908_s8, %s908_s8, %s909_s9  }
  0x1f   : > { %s793_s12 = scalar_lea.vmem %s192_s6, 2048  ;;  %p801_p2 = scmp.lt.s32.totalorder %s192_s6, %s192_s6 }
  0x20   : > { %p794_p1 = scmp.ne.s32.totalorder %s192_s6, %s793_s12  ;;  %p802_p6 = scmp.lt.s32.totalorder %s793_s12, %s793_s12 }
  0x22   : > { %p796_p13 = pnand %p794_p1, %p758_p12  ;;  %p803_p5 = por %p802_p6, %p801_p2 }
  0x24   : > { %p797_p0 = pneg %p796_p13 }
  0x26   : > { %p804_p10 = pnand %p803_p5, %p797_p0 }
  0x28   : > { %807 = shalt.err (!%p804_p10)
}
  0x29   : > { %701 = dma.hbm_to_vmem [thread:$0]  (!%p993_p11), %s1165_s3, 2048, %s192_s6, [#allocation6], %s908_s8, %s908_s8, %s909_s9  }
  0x2a   : > { %s1016_s15 = sadd.s32 1, %s904_s21   ;;  %s29_s16 = sadd.s32 1, %s900_s20 }
  0x2b   : > { %s26_s17 = ssub.s32 %s904_s21, %s1016_s15  ;;  %p36_p1 = scmp.ne.s32.totalorder %s900_s20, %s896_s19 }
  0x2c   : > { %p27_p2 = scmp.eq.s32.totalorder %s26_s17, 0  ;;  %p37_p6 = scmp.eq.s32.totalorder %s904_s21, 0 }
  0x2d   : > { %p1176_p12 = scmp.eq.s32.totalorder %s965_s22, 1  ;;  %p712_p7 = scmp.lt.s32.totalorder %s904_s21, 2 }
  0x2e   : > { %s1032_s27 = scalar_select %p27_p2, %s900_s20, %s29_s16  }
  0x2f   : > { %p1026_p3 = por %p1176_p12, %p36_p1  ;;  %p38_p9 = por %p37_p6, %p36_p1 }
  0x30   : > { %s208_s28 = sand.u32 1, %s900_s20   ;;  %s567_s30 = sshll.u32 %s904_s21, 7 }
  0x31   : > { %s1177_s23 = scalar_select %p1026_p3, 1, 0 }
  0x32   : > { %s566_s29 = sshll.u32 %s208_s28, 3  ;;  %s1039_s8 = scalar_lea.hbm %s1162_s0, %s567_s30 }
  0x33   : > { %s212_s9 = scalar_lea.vmem [#allocation2], %s566_s29  ;;  %p1041_p11 = pnand %p712_p7, %p38_p9 }
  0x34   : > { %s219_s10 = sshll.u32 %s212_s9, 4  ;;  %s209_s12 = scalar_lea.sflag [#allocation3], %s208_s28  ;;  %s220_s10 = int_to_ptr.vmem [resolvable:$true] %s219_s10 }
  0x35   : > { %s808_s13 = scalar_lea.hbm %s1039_s8, 128  ;;  %p810_p0 = pneg %p1041_p11 }
  0x36   : > { %p809_p13 = scmp.ne.s32.totalorder %s1039_s8, %s808_s13  ;;  %s813_s17 = scalar_lea.hbm %s1162_s0, 256 }
  0x37   : > { %p814_p1 = scmp.lt.s32.totalorder %s1039_s8, %s1162_s0  ;;  %p815_p2 = scmp.lt.s32.totalorder %s813_s17, %s808_s13 }
  0x38   : > { %p811_p5 = pnand %p810_p0, %p809_p13 }
  0x39   : > { %p816_p6 = por %p815_p2, %p814_p1 }
  0x3a   : > { %p812_p10 = pneg %p811_p5 }
  0x3c   : > { %p817_p12 = pnand %p816_p6, %p812_p10 }
  0x3e   : > { %820 = shalt.err (!%p817_p12)
}
  0x3f   : > { %s821_s6 = scalar_lea.vmem %s220_s10, 128  ;;  %s910_s28 = smov [#allocation2]  }
  0x40   : > { %p822_p7 = scmp.ne.s32.totalorder %s220_s10, %s821_s6  ;;  %s826_s7 = sshll.u32 %s910_s28, 4  ;;  %s827_s7 = int_to_ptr.vmem [resolvable:$false] %s826_s7 }
  0x41   : > { %s828_s9 = scalar_lea.vmem %s827_s7, 256  ;;  %p829_p13 = scmp.lt.s32.totalorder %s220_s10, %s827_s7 }
  0x42   : > { %p824_p9 = pnand %p822_p7, %p810_p0  ;;  %p830_p5 = scmp.lt.s32.totalorder %s828_s9, %s821_s6 }
  0x44   : > { %p825_p3 = pneg %p824_p9  ;;  %p831_p4 = por %p830_p5, %p829_p13 }
  0x46   : > { %p832_p8 = pnand %p831_p4, %p825_p3 }
  0x48   : > { %835 = shalt.err (!%p832_p8)
}
  0x49   : > { %705 = dma.hbm_to_vmem [thread:$0]  (!%p1041_p11), %s1039_s8, 128, %s220_s10, %s209_s12  }
  0x4a   : > { %p1179_p10 = scmp.ne.s32.totalorder %s1174_s26, 0 }
  0x4b   : > { %s1062_s13 = sand.u32 (!%p1179_p10), 1, %s896_s19   ;;  %p1180_p4 = scmp.ne.s32.totalorder (!%p1179_p10), %s1172_s24, 0 }
  0x4c   : > { %228 = sbr.rel (%p1179_p10) target bundleno = 536 (0x218), region = 40  ;;  %s569_s14 = sshll.u32 (!%p1179_p10), %s1062_s13, 3 }
  0x4d   : > { %s231_s16 = scalar_lea.sflag (!%p1179_p10), [#allocation3], %s1062_s13  ;;  %s1068_s17 = scalar_lea.vmem (!%p1179_p10), [#allocation2], %s569_s14 }
  0x51   : > { %879 = dma.done.wait (%p1180_p4), %s231_s16, 128  }
  0x52   : > { %881 = vsyncadd (%p1180_p4), %s231_s16, 4294967168  ;;  %p1181_p8 = scmp.eq.s32.totalorder %s965_s22, 0 }
  0x54   : > { %883 = dma.done.wait (%p1181_p8), [#allocation6], 4096   ;;  %p1182_p3 = pmov %p1181_p8 }
  0x55   : > { %v911_v0 = vmov 0.0   ;;  %vm912_vm0 = vmmov 0   ;;  %v285_v1 = vld [vmem:[#allocation5 + $0x78] sm:$0xff]  ;;  %v284_v2 = vld [vmem:[#allocation5 + $0x70] sm:$0xff]  ;;  %v283_v3 = vld [vmem:[#allocation5 + $0x68] sm:$0xff]  ;;  %s576_s11 = sshll.u32 %s965_s22, 7 }
  0x56   : > { %885 = vsyncadd (%p1182_p3), [#allocation6], 4294963200  ;;  %613 = vmatprep.subr.mxu0 %v911_v0  ;;  %645 = vmatprep.mubr.msk.f32.mxu0 %vm912_vm0, %v911_v0  ;;  %v282_v4 = vld [vmem:[#allocation5 + $0x60] sm:$0xff]  ;;  %v379_v5 = vld [vmem:[#allocation7 + $0x78] sm:$0xff]  ;;  %s268_s12 = scalar_lea.vmem [#allocation8], %s569_s14  ;;  %s1125_s28 = scalar_lea.hbm %s1167_s5, %s576_s11 }
  0x57   : > { %648 = vmatprep.subr.mxu1 %v911_v0  ;;  %680 = vmatprep.mubr.msk.f32.mxu1 %vm912_vm0, %v911_v0  ;;  %v281_v6 = vld [vmem:[#allocation5 + $0x58] sm:$0xff]  ;;  %v378_v7 = vld [vmem:[#allocation7 + $0x70] sm:$0xff]  ;;  %v377_v8 = vld [vmem:[#allocation7 + $0x68] sm:$0xff]  ;;  %s472_s30 = sshll.u32 %s268_s12, 4  ;;  %s459_s7 = scalar_lea.sflag [#allocation4], %s1062_s13  ;;  %s473_s30 = int_to_ptr.vmem [resolvable:$true] %s472_s30 }
  0x58   : > { %614 = vmatpush3.msra.mxu0 %v285_v1  ;;  %649 = vmatpush3.msra.mxu1 %v379_v5  ;;  %v280_v9 = vld [vmem:[#allocation5 + $0x50] sm:$0xff]  ;;  %v376_v10 = vld [vmem:[#allocation7 + $0x60] sm:$0xff]  ;;  %v279_v11 = vld [vmem:[#allocation5 + $0x48] sm:$0xff]  ;;  %s836_s9 = scalar_lea.vmem %s473_s30, 128  ;;  %p1183_p0 = scmp.ne.s32.totalorder %s1177_s23, 0 }
  0x59   : > { %615 = vmatprep.subr.mxu0 %v911_v0  ;;  %650 = vmatprep.subr.mxu1 %v911_v0  ;;  %v375_v12 = vld [vmem:[#allocation7 + $0x58] sm:$0xff]  ;;  %v278_v13 = vld [vmem:[#allocation5 + $0x40] sm:$0xff]  ;;  %v374_v14 = vld [vmem:[#allocation7 + $0x50] sm:$0xff]  ;;  %p837_p11 = scmp.ne.s32.totalorder %s473_s30, %s836_s9  ;;  %s913_s22 = smov [#allocation8]  }
  0x5a   : > { %616 = vmatpush3.msra.mxu0 %v284_v2  ;;  %651 = vmatpush3.msra.mxu1 %v378_v7  ;;  %v277_v15 = vld [vmem:[#allocation5 + $0x38] sm:$0xff]  ;;  %v373_v16 = vld [vmem:[#allocation7 + $0x48] sm:$0xff]  ;;  %v276_v17 = vld [vmem:[#allocation5 + $0x30] sm:$0xff]  ;;  %s840_s16 = sshll.u32 %s913_s22, 4  ;;  %s841_s16 = int_to_ptr.vmem [resolvable:$false] %s840_s16 }
  0x5b   : > { %617 = vmatprep.subr.mxu0 %v911_v0  ;;  %652 = vmatprep.subr.mxu1 %v911_v0  ;;  %v275_v18 = vld [vmem:[#allocation5 + $0x28] sm:$0xff]  ;;  %v274_v19 = vld [vmem:[#allocation5 + $0x20] sm:$0xff]  ;;  %v273_v20 = vld [vmem:[#allocation5 + $0x18] sm:$0xff]  ;;  %p838_p1 = pnand %p837_p11, %p1183_p0  ;;  %s842_s14 = scalar_lea.vmem %s841_s16, 256 }
  0x5c   : > { %618 = vmatpush3.msra.mxu0 %v283_v3  ;;  %653 = vmatpush3.msra.mxu1 %v377_v8  ;;  %v272_v21 = vld [vmem:[#allocation5 + $0x10] sm:$0xff]  ;;  %v271_v22 = vld [vmem:[#allocation5 + $0x8] sm:$0xff]  ;;  %v270_v23 = vld [vmem:[#allocation5] sm:$0xff]  ;;  %p843_p6 = scmp.lt.s32.totalorder %s473_s30, %s841_s16  ;;  %p844_p12 = scmp.lt.s32.totalorder %s842_s14, %s836_s9 }
  0x5d   : > { %619 = vmatprep.subr.mxu0 %v911_v0  ;;  %654 = vmatprep.subr.mxu1 %v911_v0  ;;  %v269_v24 = vld [vmem:[%s1068_s17] sm:$0xff]  ;;  %v372_v25 = vld [vmem:[#allocation7 + $0x40] sm:$0xff]  ;;  %v369_v28 = vld [vmem:[#allocation7 + $0x28] sm:$0xff]  ;;  %p839_p2 = pneg %p838_p1 }
  0x5e   : > { %620 = vmatpush3.msra.mxu0 %v282_v4  ;;  %655 = vmatpush3.msra.mxu1 %v376_v10  ;;  %v371_v26 = vld [vmem:[#allocation7 + $0x38] sm:$0xff]  ;;  %v370_v27 = vld [vmem:[#allocation7 + $0x30] sm:$0xff]  ;;  %v368_v29 = vld [vmem:[#allocation7 + $0x20] sm:$0xff]  ;;  %p845_p7 = por %p844_p12, %p843_p6 }
  0x5f   : > { %621 = vmatprep.subr.mxu0 %v911_v0  ;;  %656 = vmatprep.subr.mxu1 %v911_v0  ;;  %v367_v30 = vld [vmem:[#allocation7 + $0x18] sm:$0xff]  ;;  %v366_v31 = vld [vmem:[#allocation7 + $0x10] sm:$0xff]  ;;  %v365_v32 = vld [vmem:[#allocation7 + $0x8] sm:$0xff] }
  0x60   : > { %622 = vmatpush3.msra.mxu0 %v281_v6  ;;  %657 = vmatpush3.msra.mxu1 %v375_v12  ;;  %v364_v33 = vld [vmem:[#allocation7] sm:$0xff]  ;;  %v573_v34 = vld [vmem:[%s1164_s2] ss:$0 sm:$0xff]  ;;  %p846_p9 = pnand %p845_p7, %p839_p2 }
  0x61   : > { %623 = vmatprep.subr.mxu0 %v911_v0  ;;  %658 = vmatprep.subr.mxu1 %v911_v0  ;;  %v574_v39 = vld [vmem:[%s1166_s4] ss:$0 sm:$0xff] }
  0x62   : > { %624 = vmatpush3.msra.mxu0 %v280_v9  ;;  %659 = vmatpush3.msra.mxu1 %v374_v14 }
  0x63   : > { %625 = vmatprep.subr.mxu0 %v911_v0  ;;  %660 = vmatprep.subr.mxu1 %v911_v0 }
  0x64   : > { %626 = vmatpush3.msra.mxu0 %v279_v11  ;;  %661 = vmatpush3.msra.mxu1 %v373_v16 }
  0x65   : > { %627 = vmatprep.subr.mxu0 %v911_v0  ;;  %662 = vmatprep.subr.mxu1 %v911_v0 }
  0x66   : > { %628 = vmatpush3.msra.mxu0 %v278_v13  ;;  %663 = vmatpush3.msra.mxu1 %v372_v25 }
  0x67   : > { %629 = vmatprep.subr.mxu0 %v911_v0  ;;  %664 = vmatprep.subr.mxu1 %v911_v0 }
  0x68   : > { %630 = vmatpush3.msra.mxu0 %v277_v15  ;;  %665 = vmatpush3.msra.mxu1 %v371_v26 }
  0x69   : > { %631 = vmatprep.subr.mxu0 %v911_v0  ;;  %666 = vmatprep.subr.mxu1 %v911_v0 }
  0x6a   : > { %632 = vmatpush3.msra.mxu0 %v276_v17  ;;  %667 = vmatpush3.msra.mxu1 %v370_v27 }
  0x6b   : > { %633 = vmatprep.subr.mxu0 %v911_v0  ;;  %668 = vmatprep.subr.mxu1 %v911_v0 }
  0x6c   : > { %634 = vmatpush3.msra.mxu0 %v275_v18  ;;  %669 = vmatpush3.msra.mxu1 %v369_v28 }
  0x6d   : > { %635 = vmatprep.subr.mxu0 %v911_v0  ;;  %670 = vmatprep.subr.mxu1 %v911_v0 }
  0x6e   : > { %636 = vmatpush3.msra.mxu0 %v274_v19  ;;  %671 = vmatpush3.msra.mxu1 %v368_v29 }
  0x6f   : > { %637 = vmatprep.subr.mxu0 %v911_v0  ;;  %672 = vmatprep.subr.mxu1 %v911_v0 }
  0x70   : > { %638 = vmatpush3.msra.mxu0 %v273_v20  ;;  %673 = vmatpush3.msra.mxu1 %v367_v30 }
  0x71   : > { %639 = vmatprep.subr.mxu0 %v911_v0  ;;  %674 = vmatprep.subr.mxu1 %v911_v0 }
  0x72   : > { %640 = vmatpush3.msra.mxu0 %v272_v21  ;;  %675 = vmatpush3.msra.mxu1 %v366_v31 }
  0x73   : > { %641 = vmatprep.subr.mxu0 %v911_v0  ;;  %676 = vmatprep.subr.mxu1 %v911_v0 }
  0x74   : > { %642 = vmatpush3.msra.mxu0 %v271_v22  ;;  %677 = vmatpush3.msra.mxu1 %v365_v32 }
  0x75   : > { %643 = vmatprep.subr.mxu0 %v911_v0  ;;  %678 = vmatprep.subr.mxu1 %v911_v0 }
  0x76   : > { %644 = vmatpush3.msra.mxu0 %v270_v23  ;;  %679 = vmatpush3.msra.mxu1 %v364_v33 }
  0x77   : > { %646 = vmatmul.mubr.f32.vlgmr.msra.gmra.mxu0 %v269_v24 }
 0x137   : > { %v359_v35 = vpop.f32.mrf.mxu0 }
 0x138   : > { %v360_v36 = vadd.f32 %v573_v34, %v359_v35 }
 0x139   : > { %v647_v37 = vpop.f32.mrf.mxu0 }
 0x13a   : > { %754 = vtanh.f32 %v360_v36 }
 0x147   : > { %v755_v38 = vpop.eup %754 }
 0x148   : > { %681 = vmatmul.mubr.f32.vlgmr.msra.gmra.mxu1 %v755_v38 }
 0x208   : > { %v453_v40 = vpop.f32.mrf.mxu1 }
 0x209   : > { %v454_v41 = vadd.f32 %v574_v39, %v453_v40 }
 0x20a   : > { %v682_v42 = vpop.f32.mrf.mxu1 }
 0x20b   : > { %457 = vst [vmem:[%s268_s12] sm:$0xff] %v454_v41 }
 0x20c   : > { %849 = shalt.err (!%p846_p9)
}
 0x20d   : > { %s850_s17 = scalar_lea.hbm %s1125_s28, 128  ;;  %s854_s26 = scalar_lea.hbm %s1167_s5, 256 }
 0x20e   : > { %p851_p13 = scmp.ne.s32.totalorder %s1125_s28, %s850_s17  ;;  %p855_p4 = scmp.lt.s32.totalorder %s1125_s28, %s1167_s5 }
 0x20f   : > { %p856_p8 = scmp.lt.s32.totalorder %s854_s26, %s850_s17 }
 0x210   : > { %p852_p5 = pnand %p851_p13, %p1183_p0 }
 0x211   : > { %p857_p3 = por %p856_p8, %p855_p4 }
 0x212   : > { %p853_p10 = pneg %p852_p5 }
 0x214   : > { %p858_p11 = pnand %p857_p3, %p853_p10 }
 0x216   : > { %861 = shalt.err (!%p858_p11)
}
 0x217   : > { %693 = dma.vmem_to_hbm [thread:$0]  (%p1183_p0), %s473_s30, 128, %s1125_s28, %s459_s7  }
 0x218 PF: > { %s484_s11 = sand.u32 1, %s892_s18   ;;  %p1184_p1 = scmp.ne.s32.totalorder %s1173_s25, 0 }
 0x219   : > { %p1185_p2 = scmp.ge.s32.totalorder %s904_s21, 2  ;;  %s485_s12 = scalar_lea.sflag [#allocation4], %s484_s11 }
 0x21b   : > { %p707_p6 = pnand %p1185_p2, %p1184_p1 }
 0x21d   : > { %p708_p12 = pneg %p707_p6 }
 0x21f   : > { %887 = dma.done.wait (%p708_p12), %s485_s12, 128  }
 0x220   : > { %889 = vsyncadd (%p708_p12), %s485_s12, 4294967168  ;;  %p19_p7 = scmp.ge.s32.totalorder %s1016_s15, 4   ;;  %s1186_s18 = smov %s896_s19 }
 0x221   : > { %s1187_s19 = smov %s900_s20  ;;  %s1188_s20 = smov %s1032_s27 }
 0x222   : > { %s1189_s21 = smov %s1016_s15  ;;  %21 = sbr.rel (!%p19_p7) target bundleno = 6 (0x6), region = 93 }
 0x227   :  { %490 = vsyncpa [#allocation3], 1 }
 0x228   :  { %492 = vsyncpa [#allocation3 + $0x1], 1 }
 0x229   :  { %493 = vsyncpa [#allocation6], 1 }
 0x22a   :  { %494 = vsyncpa [#allocation4], 1 }
 0x22b   :  { %496 = vsyncpa [#allocation4 + $0x1], 1 }

</bundles_post_ra>
